<compile_context>
chip_gen: v5e
topology: v5e:2x2
jax: 0.10.0
libtpu: 0.0.40
codegen_flags: <defaults>
</compile_context>

<pallas_src>
import math

import numpy as np
import jax
import jax.numpy as jnp
from jax.experimental import pallas as pl
from jax.experimental.pallas import tpu as pltpu


# ------------------------------------------------------------------
# Parameter construction (glue, matches the PyTorch __init__ exactly)
# ------------------------------------------------------------------
def _warp(omega, alpha, theta):
    x = omega - theta
    y = omega + theta
    return (
        omega
        + np.arctan2(alpha * np.sin(x), 1 - alpha * np.cos(x))
        + np.arctan2(alpha * np.sin(y), 1 - alpha * np.cos(y))
    )


def make_cft_matrix(in_order, out_order, alpha, theta, n_fft=512, dtype=np.float32):
    assert 0 <= in_order
    assert 0 <= out_order
    assert out_order < n_fft
    assert abs(alpha) < 1
    assert 0 <= theta <= 1
    theta = theta * np.pi
    delta = 2 * np.pi / n_fft
    omega = np.arange(n_fft) * delta
    ww = _warp(omega, alpha, theta)
    m2 = np.arange(out_order + 1)
    wwm2 = ww.reshape(-1, 1) * m2.reshape(1, -1)
    real = np.cos(wwm2)
    imag = -np.sin(wwm2)
    M1 = in_order + 1
    A = np.fft.ifft(real + 1j * imag, axis=0).real
    if 2 <= M1:
        A[1:M1] += np.flip(A[-(M1 - 1):], axis=0)
    A = A[:M1]
    return A.astype(dtype)  # shape (in_order+1, out_order+1)


# ------------------------------------------------------------------
# Pallas kernel: row-tiled matmul with a VMEM-resident weight
# ------------------------------------------------------------------
def _rowblock_matmul_kernel(x_ref, w_ref, o_ref):
    o_ref[...] = jnp.dot(
        x_ref[...], w_ref[...], preferred_element_type=jnp.float32
    ).astype(o_ref.dtype)


def _round_up(n, m):
    return ((n + m - 1) // m) * m


# Per-step (single-buffered) in+out tile budget; double buffering ~doubles it.
_VMEM_TILE_BUDGET = 6 * 1024 * 1024


def _row_tiled_matmul(x, w, block_rows):
    """x: (N, K), w: (K, Nout) resident -> x @ w, row-tiled over N.

    Requires N % 8 == 0 (caller pads)."""
    N, K = x.shape
    K2, Nout = w.shape
    assert K == K2
    assert N % 8 == 0

    itemsize = x.dtype.itemsize
    bn = _round_up(min(block_rows, N), 8)          # <= N, multiple of 8
    max_bn = max(8, (_VMEM_TILE_BUDGET // ((K + Nout) * itemsize)) // 8 * 8)
    bn = min(bn, max_bn)

    grid = (pl.cdiv(N, bn),)
    cost = pl.CostEstimate(
        flops=2 * N * K * Nout,
        transcendentals=0,
        bytes_accessed=itemsize * (N * K + K * Nout + N * Nout),
    )

    return pl.pallas_call(
        _rowblock_matmul_kernel,
        out_shape=jax.ShapeDtypeStruct((N, Nout), x.dtype),
        grid_spec=pltpu.PrefetchScalarGridSpec(
            num_scalar_prefetch=0,
            grid=grid,
            in_specs=[
                pl.BlockSpec((bn, K), lambda i: (i, 0)),
                pl.BlockSpec((K, Nout), lambda i: (0, 0)),  # resident weight
            ],
            out_specs=pl.BlockSpec((bn, Nout), lambda i: (i, 0)),
        ),
        compiler_params=pltpu.CompilerParams(
            dimension_semantics=("parallel",),
            vmem_limit_bytes=32 * 1024 * 1024,
        ),
        cost_estimate=cost,
    )(x, w)


# ------------------------------------------------------------------
# Wrapper: CoefficientsFrequencyTransform forward
# ------------------------------------------------------------------
def coefficients_frequency_transform(
    c1, A, *, block_rows=32768, max_packed_matrix_bytes=2 * 1024 * 1024
):
    """c1: (..., M1), A: (M1, M2) -> (..., M2). Same semantics as torch.matmul."""
    A = jnp.asarray(A)
    M1, M2 = A.shape
    lead_shape = c1.shape[:-1]
    assert c1.shape[-1] == M1

    n_rows = int(np.prod(lead_shape)) if lead_shape else 1
    if n_rows == 0:
        return jnp.zeros((*lead_shape, M2), dtype=c1.dtype)

    c1_flat = c1.reshape(n_rows, M1)
    dtype = c1.dtype

    # Lane-density packing: P logical rows per packed row so the packed
    # coefficient axis P*M1 is a multiple of 128 (full vreg lanes).
    P = 128 // math.gcd(M1, 128)
    packed_w_bytes = (P * M1) * (P * M2) * A.dtype.itemsize
    use_packed = (P > 1) and (packed_w_bytes <= max_packed_matrix_bytes)

    if use_packed:
        row_align = 8 * P                      # packed rows become a multiple of 8
        n_pad = _round_up(n_rows, row_align)
        if n_pad != n_rows:
            c1_flat = jnp.pad(c1_flat, ((0, n_pad - n_rows), (0, 0)))
        # Free row-major views: no transpose, no data movement.
        x = c1_flat.reshape(n_pad // P, P * M1)
        w = jnp.kron(jnp.eye(P, dtype=A.dtype), A).astype(dtype)  # block-diagonal
        out_packed = _row_tiled_matmul(x, w, max(8, block_rows // P))
        out_flat = out_packed.reshape(n_pad, M2)[:n_rows]
    else:
        n_pad = _round_up(n_rows, 8)
        if n_pad != n_rows:
            c1_flat = jnp.pad(c1_flat, ((0, n_pad - n_rows), (0, 0)))
        out_flat = _row_tiled_matmul(c1_flat, A.astype(dtype), block_rows)[:n_rows]

    return out_flat.reshape(*lead_shape, M2)


# ------------------------------------------------------------------
# Demo / self-check
# ------------------------------------------------------------------
if __name__ == "__main__":
    # Module hyperparameters (deterministic, in-script)
    in_order = 7      # M1 = 8
    out_order = 15    # M2 = 16
    alpha = 0.1
    theta = 0.5
    n_fft = 512

    A = jnp.asarray(make_cft_matrix(in_order, out_order, alpha, theta, n_fft))  # (8, 16)

    key = jax.random.PRNGKey(0)
    k1, k2 = jax.random.split(key)

    # (a) small batch -> packed lane-dense path, single grid step
    c1a = jax.random.normal(k1, (2, 8, in_order + 1), dtype=jnp.float32)
    c2a = jax.block_until_ready(coefficients_frequency_transform(c1a, A))
    np.testing.assert_allclose(
        np.asarray(c2a), np.asarray(jnp.matmul(c1a, A)), rtol=1e-5, atol=1e-5
    )

    # (b) ragged row count + small block_rows -> multi-step grid with a masked
    #     edge tile and wrapper zero-padding/slicing
    c1b = jax.random.normal(k2, (1, 300, in_order + 1), dtype=jnp.float32)
    c2b = jax.block_until_ready(
        coefficients_frequency_transform(c1b, A, block_rows=256)
    )
    np.testing.assert_allclose(
        np.asarray(c2b), np.asarray(jnp.matmul(c1b, A)), rtol=1e-5, atol=1e-5
    )

    # (c) force the unpacked fallback path (same kernel, operands c1_flat / A)
    c2c = jax.block_until_ready(
        coefficients_frequency_transform(c1a, A, max_packed_matrix_bytes=0)
    )
    np.testing.assert_allclose(
        np.asarray(c2c), np.asarray(jnp.matmul(c1a, A)), rtol=1e-5, atol=1e-5
    )

    print("KERNEL_OK")
</pallas_src>

<mosaic_0001>
module attributes {stable_mosaic.version = 11 : i64} {
  func.func @_rowblock_matmul_kernel(%arg0: i32, %arg1: memref<8x128xf32, #tpu.memory_space<vmem>>, %arg2: memref<128x256xf32, #tpu.memory_space<vmem>>, %arg3: memref<8x256xf32, #tpu.memory_space<vmem>>) attributes {dimension_semantics = [#tpu.dimension_semantics<parallel>], iteration_bounds = array<i64: 1>, scalar_prefetch = 0 : i64, scratch_operands = 0 : i64, tpu.core_type = #tpu.core_type<tc>, window_params = [{transform_indices = @transform_0, window_bounds = array<i64: 8, 128>}, {pipeline_mode = #tpu.pipeline_mode<synchronous>, transform_indices = @transform_1, window_bounds = array<i64: 128, 256>}, {transform_indices = @transform_2, window_bounds = array<i64: 8, 256>}]} {
    %c0 = arith.constant 0 : index
    %c0_0 = arith.constant 0 : index
    %0 = vector.load %arg1[%c0, %c0_0] : memref<8x128xf32, #tpu.memory_space<vmem>>, vector<8x128xf32>
    %c0_1 = arith.constant 0 : index
    %c0_2 = arith.constant 0 : index
    %1 = vector.load %arg2[%c0_1, %c0_2] : memref<128x256xf32, #tpu.memory_space<vmem>>, vector<128x256xf32>
    %cst = arith.constant dense<0.000000e+00> : vector<8x256xf32>
    %2 = tpu.matmul %0, %1, %cst {dimension_numbers = #tpu.dot_dimension_numbers<[1], [0], [0], [1], [0, 0, 1, 1], [], []>} : vector<8x128xf32>, vector<128x256xf32>, vector<8x256xf32> -> vector<8x256xf32>
    %c0_3 = arith.constant 0 : index
    %c0_4 = arith.constant 0 : index
    %3 = vector.load %arg3[%c0_3, %c0_4] : memref<8x256xf32, #tpu.memory_space<vmem>>, vector<8x256xf32>
    tpu.vector_store %arg3[%c0_3, %c0_4], %2 {strides = array<i32>} : memref<8x256xf32, #tpu.memory_space<vmem>>, vector<8x256xf32>,
    return
  }
  func.func @transform_0(%arg0: i32) -> (i32, i32) {
    %c0_i32 = arith.constant 0 : i32
    %c0_i32_0 = arith.constant 0 : i32
    return %arg0, %c0_i32 : i32, i32
  }
  func.func @transform_1(%arg0: i32) -> (i32, i32) {
    %c0_i32 = arith.constant 0 : i32
    %c0_i32_0 = arith.constant 0 : i32
    %c0_i32_1 = arith.constant 0 : i32
    return %c0_i32, %c0_i32_0 : i32, i32
  }
  func.func @transform_2(%arg0: i32) -> (i32, i32) {
    %c0_i32 = arith.constant 0 : i32
    %c0_i32_0 = arith.constant 0 : i32
    return %arg0, %c0_i32 : i32, i32
  }
}

</mosaic_0001>

<bundles_post_ra>
// kernel: tpu_custom_call.1
= control target key start
LH: loop header
LB: loop body
LE: loop exit
PB: predicated region body
PF: predicated region fallthrough
CT: control target
= control target key end

     0   :  { %7 = vsyncpa [#allocation3], 0  ;;  %s247_s0 = inlined_call_operand.hbm [shape: f32[8,128], index: 0, kind: input, shape index: {}]   ;;  %s248_s1 = inlined_call_operand.hbm [shape: f32[128,256], index: 1, kind: input, shape index: {}]   ;;  %s249_s2 = inlined_call_operand.hbm [shape: f32[8,256], index: 2, kind: output, shape index: {}]  }
   0x1   :  { %8 = vsyncpa [#allocation6], 0 }
   0x2   :  { %9 = vsyncpa [#allocation4], 0  ;;  %s15_s11 = sshll.u32 %s247_s0, 4  ;;  %s218_s12 = smov [#allocation2]   ;;  %s16_s11 = int_to_ptr.hbm [resolvable:$true] %s15_s11 }
   0x3   :  { %s17_s13 = sshll.u32 %s218_s12, 4  ;;  %s25_s16 = sshll.u32 %s248_s1, 4  ;;  %s18_s13 = int_to_ptr.vmem [resolvable:$true] %s17_s13  ;;  %s26_s16 = int_to_ptr.hbm [resolvable:$true] %s25_s16 }
   0x4   :  { %20 = dma.hbm_to_vmem [thread:$0]  %s16_s11, 128, %s18_s13, [#allocation3]  }
   0x5   :  { %s219_s17 = smov [#allocation5]   ;;  %s220_s19 = smov 256  }
   0x6   :  { %s27_s18 = sshll.u32 %s219_s17, 4  ;;  %s221_s20 = smov 16   ;;  %s28_s18 = int_to_ptr.vmem [resolvable:$true] %s27_s18 }
   0x7   :  { %33 = dma.hbm_to_vmem [thread:$0]  %s26_s16, 4096, %s28_s18, [#allocation6], %s220_s19, %s220_s19, %s221_s20  }
   0x8   :  { %212 = dma.done.wait [#allocation3], 128  }
   0x9   :  { %213 = vsyncadd [#allocation3], 4294967168 }
   0xa   :  { %214 = dma.done.wait [#allocation6], 4096  }
   0xb   :  { %215 = vsyncadd [#allocation6], 4294963200  ;;  %v73_v0 = vld [vmem:[#allocation5 + $0xf0] sm:$0xff]  ;;  %v74_v1 = vld [vmem:[#allocation5 + $0xf8] sm:$0xff]  ;;  %s222_s0 = smov [#allocation7]   ;;  %s124_s23 = sshll.u32 %s249_s2, 4  ;;  %s125_s23 = int_to_ptr.hbm [resolvable:$true] %s124_s23 }
   0xc   :  { %v71_v2 = vld [vmem:[#allocation5 + $0xe0] sm:$0xff]  ;;  %75 = vmatpush.msra.mxu0 %v73_v0  ;;  %95 = vmatpush.msra.mxu1 %v74_v1  ;;  %v72_v3 = vld [vmem:[#allocation5 + $0xe8] sm:$0xff]  ;;  %v69_v4 = vld [vmem:[#allocation5 + $0xd0] sm:$0xff]  ;;  %s122_s1 = sshll.u32 %s222_s0, 4  ;;  %s123_s1 = int_to_ptr.vmem [resolvable:$true] %s122_s1 }
   0xd   :  { %v70_v5 = vld [vmem:[#allocation5 + $0xd8] sm:$0xff]  ;;  %v67_v6 = vld [vmem:[#allocation5 + $0xc0] sm:$0xff]  ;;  %v68_v7 = vld [vmem:[#allocation5 + $0xc8] sm:$0xff] }
   0xe   :  { %76 = vmatpush.msra.mxu0 %v71_v2  ;;  %96 = vmatpush.msra.mxu1 %v72_v3  ;;  %v65_v8 = vld [vmem:[#allocation5 + $0xb0] sm:$0xff]  ;;  %v66_v9 = vld [vmem:[#allocation5 + $0xb8] sm:$0xff]  ;;  %v63_v10 = vld [vmem:[#allocation5 + $0xa0] sm:$0xff] }
   0xf   :  { %v64_v11 = vld [vmem:[#allocation5 + $0xa8] sm:$0xff]  ;;  %v61_v12 = vld [vmem:[#allocation5 + $0x90] sm:$0xff]  ;;  %v62_v13 = vld [vmem:[#allocation5 + $0x98] sm:$0xff] }
  0x10   :  { %77 = vmatpush.msra.mxu0 %v69_v4  ;;  %97 = vmatpush.msra.mxu1 %v70_v5  ;;  %v59_v14 = vld [vmem:[#allocation5 + $0x80] sm:$0xff]  ;;  %v60_v15 = vld [vmem:[#allocation5 + $0x88] sm:$0xff]  ;;  %v57_v16 = vld [vmem:[#allocation5 + $0x70] sm:$0xff] }
  0x11   :  { %v58_v17 = vld [vmem:[#allocation5 + $0x78] sm:$0xff]  ;;  %v55_v18 = vld [vmem:[#allocation5 + $0x60] sm:$0xff]  ;;  %v56_v19 = vld [vmem:[#allocation5 + $0x68] sm:$0xff] }
  0x12   :  { %78 = vmatpush.msra.mxu0 %v67_v6  ;;  %98 = vmatpush.msra.mxu1 %v68_v7  ;;  %v53_v20 = vld [vmem:[#allocation5 + $0x50] sm:$0xff]  ;;  %v54_v21 = vld [vmem:[#allocation5 + $0x58] sm:$0xff]  ;;  %v51_v22 = vld [vmem:[#allocation5 + $0x40] sm:$0xff] }
  0x13   :  { %v52_v23 = vld [vmem:[#allocation5 + $0x48] sm:$0xff]  ;;  %v49_v24 = vld [vmem:[#allocation5 + $0x30] sm:$0xff]  ;;  %v50_v25 = vld [vmem:[#allocation5 + $0x38] sm:$0xff] }
  0x14   :  { %79 = vmatpush.msra.mxu0 %v65_v8  ;;  %99 = vmatpush.msra.mxu1 %v66_v9  ;;  %v47_v26 = vld [vmem:[#allocation5 + $0x20] sm:$0xff]  ;;  %v48_v27 = vld [vmem:[#allocation5 + $0x28] sm:$0xff]  ;;  %v45_v28 = vld [vmem:[#allocation5 + $0x10] sm:$0xff] }
  0x15   :  { %v46_v29 = vld [vmem:[#allocation5 + $0x18] sm:$0xff]  ;;  %v43_v30 = vld [vmem:[#allocation5] sm:$0xff]  ;;  %v44_v31 = vld [vmem:[#allocation5 + $0x8] sm:$0xff] }
  0x16   :  { %80 = vmatpush.msra.mxu0 %v63_v10  ;;  %100 = vmatpush.msra.mxu1 %v64_v11  ;;  %v42_v32 = vld [vmem:[#allocation2] sm:$0xff] }
  0x18   :  { %81 = vmatpush.msra.mxu0 %v61_v12  ;;  %101 = vmatpush.msra.mxu1 %v62_v13 }
  0x1a   :  { %82 = vmatpush.msra.mxu0 %v59_v14  ;;  %102 = vmatpush.msra.mxu1 %v60_v15 }
  0x1c   :  { %83 = vmatpush.msra.mxu0 %v57_v16  ;;  %103 = vmatpush.msra.mxu1 %v58_v17 }
  0x1e   :  { %84 = vmatpush.msra.mxu0 %v55_v18  ;;  %104 = vmatpush.msra.mxu1 %v56_v19 }
  0x20   :  { %85 = vmatpush.msra.mxu0 %v53_v20  ;;  %105 = vmatpush.msra.mxu1 %v54_v21 }
  0x22   :  { %86 = vmatpush.msra.mxu0 %v51_v22  ;;  %106 = vmatpush.msra.mxu1 %v52_v23 }
  0x24   :  { %87 = vmatpush.msra.mxu0 %v49_v24  ;;  %107 = vmatpush.msra.mxu1 %v50_v25 }
  0x26   :  { %88 = vmatpush.msra.mxu0 %v47_v26  ;;  %108 = vmatpush.msra.mxu1 %v48_v27 }
  0x28   :  { %89 = vmatpush.msra.mxu0 %v45_v28  ;;  %109 = vmatpush.msra.mxu1 %v46_v29 }
  0x2a   :  { %90 = vmatpush.msra.mxu0 %v43_v30  ;;  %110 = vmatpush.msra.mxu1 %v44_v31 }
  0x2b   :  { %91 = vmatmul.f32.vlgmr.msra.gmra.mxu0 %v42_v32  ;;  %111 = vmatmul.f32.vlgmr.msra.gmra.mxu1 %v42_v32 }
  0xa8   :  { %v92_v33 = vpop.f32.mrf.mxu0  ;;  %v112_v34 = vpop.f32.mrf.mxu1 }
  0xa9   :  { %115 = vst [vmem:[#allocation7] sm:$0xff] %v92_v33 }
  0xaa   :  { %116 = vst [vmem:[#allocation7 + $0x8] sm:$0xff] %v112_v34 }
  0xab   :  { %127 = dma.vmem_to_hbm [thread:$0]  %s123_s1, 256, %s125_s23, [#allocation4]  }
  0xac   :  { %216 = dma.done.wait [#allocation4], 256  }
  0xad   :  { %217 = vsyncadd [#allocation4], 4294967040 }
  0xae   :  { %132 = vsyncpa [#allocation3], 1 }
  0xaf   :  { %133 = vsyncpa [#allocation6], 1 }
  0xb0   :  { %134 = vsyncpa [#allocation4], 1 }

</bundles_post_ra>
